<compile_context>
chip_gen: v7x
topology: tpu7x:2x2x1
jax: 0.10.0
libtpu: 0.0.40
codegen_flags: <defaults>
</compile_context>

<pallas_src>
import functools
import math

import jax
import jax.numpy as jnp
from jax.experimental import pallas as pl
from jax.experimental.pallas import tpu as pltpu


def _attention_kernel(x_ref, wqkv_ref, wproj_ref, bproj_ref, o_ref, *,
                      num_heads: int, head_dim: int):
    # x_ref:     (N, C)        bf16  (batch dim squeezed by BlockSpec)
    # wqkv_ref:  (H, C, 3*hd)  bf16  per-head fused [q|k|v] weight, q pre-scaled
    # wproj_ref: (H, hd, C)    bf16  per-head slice of the output projection
    # bproj_ref: (1, C)        f32
    # o_ref:     (N, C)        f32/x.dtype  (written exactly once)
    H, hd = num_heads, head_dim
    N, C = x_ref.shape

    x = x_ref[...]                                         # (N, C) bf16
    xh = jnp.broadcast_to(x, (H, N, C))                    # (H, N, C)

    # Fused per-head QKV projection (single weight stream, single batched
    # matmul).  Softmax scale is already folded into the q columns.
    qkv = jnp.einsum("hnc,hcd->hnd", xh, wqkv_ref[...],
                     preferred_element_type=jnp.float32)   # (H, N, 3*hd)
    q = qkv[..., 0 * hd:1 * hd].astype(jnp.bfloat16)       # (H, N, hd)
    k = qkv[..., 1 * hd:2 * hd].astype(jnp.bfloat16)
    v = qkv[..., 2 * hd:3 * hd].astype(jnp.bfloat16)

    # Scores + softmax: elementwise math in f32 (VPU), reciprocal on the EUP.
    logits = jnp.einsum("hnd,hmd->hnm", q, k,
                        preferred_element_type=jnp.float32)  # (H, N, N)
    logits = logits - jnp.max(logits, axis=-1, keepdims=True)
    p = jnp.exp(logits)
    p = p * pl.reciprocal(jnp.sum(p, axis=-1, keepdims=True), approx=True)
    # attn_drop / proj_drop are identity (p = 0.0 module defaults).

    ctx = jnp.einsum("hnm,hmd->hnd", p.astype(jnp.bfloat16), v,
                     preferred_element_type=jnp.float32)     # (H, N, hd)

    # Per-head output-projection partials, reduced over heads in f32 and
    # stored once (no read-modify-write over the output block, and the
    # accumulation never happens in the output dtype).
    partial = jnp.einsum("hnd,hdc->hnc", ctx.astype(jnp.bfloat16),
                         wproj_ref[...],
                         preferred_element_type=jnp.float32)  # (H, N, C)
    out = jnp.sum(partial, axis=0) + bproj_ref[...]           # (N, C) f32
    o_ref[...] = out.astype(o_ref.dtype)


def attention_pallas(x, w_qkv, w_proj, b_proj, *, num_heads: int):
    """x: (B, N, C) f32.  w_qkv: (C, 3C), w_proj: (C, C), b_proj: (C,) f32.

    Weights are in (in_features, out_features) layout, i.e. the transpose of
    the PyTorch nn.Linear weight; the column order of w_qkv is the torch
    layout out_col = qkv_idx * C + head * head_dim + dim.
    """
    B, N, C = x.shape
    head_dim = C // num_heads
    scale = head_dim ** (-0.5)
    out_dtype = x.dtype

    # --- Weight prep (hoist/cache with the params in a real model). ---
    w = w_qkv.reshape(C, 3, num_heads, head_dim)                  # (C,3,H,hd)
    wq = jnp.transpose(w[:, 0], (1, 0, 2)) * scale                # (H,C,hd), scale folded
    wk = jnp.transpose(w[:, 1], (1, 0, 2))
    wv = jnp.transpose(w[:, 2], (1, 0, 2))
    wqkv = jnp.concatenate([wq, wk, wv], axis=-1).astype(jnp.bfloat16)  # (H,C,3hd)
    wp = w_proj.reshape(num_heads, head_dim, C).astype(jnp.bfloat16)    # (H,hd,C)
    b2 = b_proj.reshape(1, C).astype(jnp.float32)
    x_bf16 = x.astype(jnp.bfloat16)                               # halve x DMA bytes

    kernel = functools.partial(_attention_kernel,
                               num_heads=num_heads, head_dim=head_dim)

    return pl.pallas_call(
        kernel,
        out_shape=jax.ShapeDtypeStruct((B, N, C), out_dtype),
        grid_spec=pltpu.PrefetchScalarGridSpec(
            num_scalar_prefetch=0,
            grid=(B,),
            in_specs=[
                # Activations for this batch.
                pl.BlockSpec((pl.Squeezed(), N, C), lambda b: (b, 0, 0)),
                # Fused per-head QKV weight (grid-invariant).
                pl.BlockSpec((num_heads, C, 3 * head_dim), lambda b: (0, 0, 0)),
                # Per-head output-projection weight (grid-invariant).
                pl.BlockSpec((num_heads, head_dim, C), lambda b: (0, 0, 0)),
                # Projection bias (grid-invariant).
                pl.BlockSpec((1, C), lambda b: (0, 0)),
            ],
            out_specs=pl.BlockSpec((pl.Squeezed(), N, C), lambda b: (b, 0, 0)),
        ),
        compiler_params=pltpu.CompilerParams(
            dimension_semantics=("parallel",),
        ),
    )(x_bf16, wqkv, wp, b2)


def attention_reference(x, w_qkv, w_proj, b_proj, *, num_heads: int):
    """Pure-JAX f32 reference mirroring the PyTorch forward exactly."""
    B, N, C = x.shape
    head_dim = C // num_heads
    scale = head_dim ** (-0.5)
    qkv = x @ w_qkv                                            # (B, N, 3C)
    qkv = qkv.reshape(B, N, 3, num_heads, head_dim)
    qkv = jnp.transpose(qkv, (2, 0, 3, 1, 4))                  # (3, B, H, N, hd)
    q, k, v = qkv[0], qkv[1], qkv[2]
    attn = jnp.einsum("bhnd,bhmd->bhnm", q, k) * scale
    attn = jax.nn.softmax(attn, axis=-1)
    out = jnp.einsum("bhnm,bhmd->bhnd", attn, v)               # (B, H, N, hd)
    out = jnp.transpose(out, (0, 2, 1, 3)).reshape(B, N, C)
    return out @ w_proj + b_proj


if __name__ == "__main__":
    # Small shapes consistent with the module: B=2, tokens N=8, channels C=32,
    # 8 heads (head_dim = 4).
    B, N, C = 2, 8, 32
    num_heads = 8

    key = jax.random.PRNGKey(0)
    kx, kqkv, kproj, kbias = jax.random.split(key, 4)

    x = jax.random.normal(kx, (B, N, C), dtype=jnp.float32)

    # Deterministic nn.Linear-like init, stored in (in, out) layout.
    bound = 1.0 / math.sqrt(C)
    w_qkv = jax.random.uniform(kqkv, (C, 3 * C), jnp.float32, -bound, bound)
    w_proj = jax.random.uniform(kproj, (C, C), jnp.float32, -bound, bound)
    b_proj = jax.random.uniform(kbias, (C,), jnp.float32, -bound, bound)
    # (qkv_bias=False -> no qkv bias; attn_drop=proj_drop=0.0 -> identity.)

    out = attention_pallas(x, w_qkv, w_proj, b_proj, num_heads=num_heads)
    out = jax.block_until_ready(out)

    ref = attention_reference(x, w_qkv, w_proj, b_proj, num_heads=num_heads)
    assert out.shape == (B, N, C)
    # bf16 MXU operands (incl. bf16 x) + approx reciprocal -> looser tolerance.
    assert jnp.allclose(out, ref, atol=2e-2, rtol=2e-2), "mismatch vs JAX reference"

    print("KERNEL_OK")
</pallas_src>

<mosaic_0001>
module attributes {stable_mosaic.version = 11 : i64} {
  func.func @_attention_kernel(%arg0: i32, %arg1: memref<1x8x32xbf16, #tpu.memory_space<vmem>>, %arg2: memref<8x32x12xbf16, #tpu.memory_space<vmem>>, %arg3: memref<8x4x32xbf16, #tpu.memory_space<vmem>>, %arg4: memref<1x32xf32, #tpu.memory_space<vmem>>, %arg5: memref<1x8x32xf32, #tpu.memory_space<vmem>>) attributes {dimension_semantics = [#tpu.dimension_semantics<parallel>], iteration_bounds = array<i64: 2>, scalar_prefetch = 0 : i64, scratch_operands = 0 : i64, tpu.core_type = #tpu.core_type<tc>, window_params = [{transform_indices = @transform_0, window_bounds = array<i64: 1, 8, 32>}, {pipeline_mode = #tpu.pipeline_mode<synchronous>, transform_indices = @transform_1, window_bounds = array<i64: 8, 32, 12>}, {pipeline_mode = #tpu.pipeline_mode<synchronous>, transform_indices = @transform_2, window_bounds = array<i64: 8, 4, 32>}, {pipeline_mode = #tpu.pipeline_mode<synchronous>, transform_indices = @transform_3, window_bounds = array<i64: 1, 32>}, {transform_indices = @transform_4, window_bounds = array<i64: 1, 8, 32>}]} {
    %c0 = arith.constant 0 : index
    %c0_0 = arith.constant 0 : index
    %c0_1 = arith.constant 0 : index
    %0 = vector.load %arg1[%c0, %c0_0, %c0_1] : memref<1x8x32xbf16, #tpu.memory_space<vmem>>, vector<1x8x32xbf16>
    %1 = vector.shape_cast %0 : vector<1x8x32xbf16> to vector<8x32xbf16>
    %2 = vector.shape_cast %1 : vector<8x32xbf16> to vector<1x8x32xbf16>
    %3 = vector.broadcast %2 : vector<1x8x32xbf16> to vector<8x8x32xbf16>
    %c0_2 = arith.constant 0 : index
    %c0_3 = arith.constant 0 : index
    %c0_4 = arith.constant 0 : index
    %4 = vector.load %arg2[%c0_2, %c0_3, %c0_4] : memref<8x32x12xbf16, #tpu.memory_space<vmem>>, vector<8x32x12xbf16>
    "tpu.trace_start"() <{level = 10 : i32, message = "hnc,hcd->hnd"}> : () -> ()
    %cst = arith.constant dense<0.000000e+00> : vector<8x8x12xf32>
    %5 = tpu.matmul %3, %4, %cst {dimension_numbers = #tpu.dot_dimension_numbers<[2], [1], [1], [2], [0, 0, 0, 1, 1, 2], [0], [0]>} : vector<8x8x32xbf16>, vector<8x32x12xbf16>, vector<8x8x12xf32> -> vector<8x8x12xf32>
    "tpu.trace_stop"() : () -> ()
    %6 = vector.extract_strided_slice %5 {offsets = [0, 0, 0], sizes = [8, 8, 4], strides = [1, 1, 1]} : vector<8x8x12xf32> to vector<8x8x4xf32>
    %7 = arith.truncf %6 : vector<8x8x4xf32> to vector<8x8x4xbf16>
    %8 = vector.extract_strided_slice %5 {offsets = [0, 0, 4], sizes = [8, 8, 4], strides = [1, 1, 1]} : vector<8x8x12xf32> to vector<8x8x4xf32>
    %9 = arith.truncf %8 : vector<8x8x4xf32> to vector<8x8x4xbf16>
    %10 = vector.extract_strided_slice %5 {offsets = [0, 0, 8], sizes = [8, 8, 4], strides = [1, 1, 1]} : vector<8x8x12xf32> to vector<8x8x4xf32>
    %11 = arith.truncf %10 : vector<8x8x4xf32> to vector<8x8x4xbf16>
    "tpu.trace_start"() <{level = 10 : i32, message = "hnd,hmd->hnm"}> : () -> ()
    %cst_5 = arith.constant dense<0.000000e+00> : vector<8x8x8xf32>
    %12 = tpu.matmul %7, %9, %cst_5 {dimension_numbers = #tpu.dot_dimension_numbers<[2], [2], [1], [1], [0, 0, 0, 1, 1, 1], [0], [0]>} : vector<8x8x4xbf16>, vector<8x8x4xbf16>, vector<8x8x8xf32> -> vector<8x8x8xf32>
    "tpu.trace_stop"() : () -> ()
    %cst_6 = arith.constant dense<0xFF800000> : vector<8x8xf32>
    %13 = vector.multi_reduction <maximumf>, %12, %cst_6 [2] : vector<8x8x8xf32> to vector<8x8xf32>
    %14 = vector.shape_cast %13 : vector<8x8xf32> to vector<8x8x1xf32>
    %15 = vector.broadcast %14 : vector<8x8x1xf32> to vector<8x8x8xf32>
    %16 = arith.subf %12, %15 : vector<8x8x8xf32>
    %17 = math.exp %16 : vector<8x8x8xf32>
    %cst_7 = arith.constant dense<0.000000e+00> : vector<8x8xf32>
    %18 = vector.multi_reduction <add>, %17, %cst_7 [2] : vector<8x8x8xf32> to vector<8x8xf32>
    %19 = vector.shape_cast %18 : vector<8x8xf32> to vector<8x8x1xf32>
    %20 = tpu.reciprocal %19 {approx = true} : vector<8x8x1xf32> -> vector<8x8x1xf32>
    %21 = vector.broadcast %20 : vector<8x8x1xf32> to vector<8x8x8xf32>
    %22 = arith.mulf %17, %21 : vector<8x8x8xf32>
    %23 = arith.truncf %22 : vector<8x8x8xf32> to vector<8x8x8xbf16>
    "tpu.trace_start"() <{level = 10 : i32, message = "hnm,hmd->hnd"}> : () -> ()
    %cst_8 = arith.constant dense<0.000000e+00> : vector<8x8x4xf32>
    %24 = tpu.matmul %23, %11, %cst_8 {dimension_numbers = #tpu.dot_dimension_numbers<[2], [1], [1], [2], [0, 0, 0, 1, 1, 2], [0], [0]>} : vector<8x8x8xbf16>, vector<8x8x4xbf16>, vector<8x8x4xf32> -> vector<8x8x4xf32>
    "tpu.trace_stop"() : () -> ()
    %25 = arith.truncf %24 : vector<8x8x4xf32> to vector<8x8x4xbf16>
    %c0_9 = arith.constant 0 : index
    %c0_10 = arith.constant 0 : index
    %c0_11 = arith.constant 0 : index
    %26 = vector.load %arg3[%c0_9, %c0_10, %c0_11] : memref<8x4x32xbf16, #tpu.memory_space<vmem>>, vector<8x4x32xbf16>
    "tpu.trace_start"() <{level = 10 : i32, message = "hnd,hdc->hnc"}> : () -> ()
    %cst_12 = arith.constant dense<0.000000e+00> : vector<8x8x32xf32>
    %27 = tpu.matmul %25, %26, %cst_12 {dimension_numbers = #tpu.dot_dimension_numbers<[2], [1], [1], [2], [0, 0, 0, 1, 1, 2], [0], [0]>} : vector<8x8x4xbf16>, vector<8x4x32xbf16>, vector<8x8x32xf32> -> vector<8x8x32xf32>
    "tpu.trace_stop"() : () -> ()
    %cst_13 = arith.constant dense<0.000000e+00> : vector<8x32xf32>
    %28 = vector.multi_reduction <add>, %27, %cst_13 [0] : vector<8x8x32xf32> to vector<8x32xf32>
    %c0_14 = arith.constant 0 : index
    %c0_15 = arith.constant 0 : index
    %29 = vector.load %arg4[%c0_14, %c0_15] : memref<1x32xf32, #tpu.memory_space<vmem>>, vector<1x32xf32>
    %30 = vector.broadcast %29 : vector<1x32xf32> to vector<8x32xf32>
    %31 = arith.addf %28, %30 : vector<8x32xf32>
    %c0_16 = arith.constant 0 : index
    %c0_17 = arith.constant 0 : index
    %c0_18 = arith.constant 0 : index
    %32 = vector.load %arg5[%c0_16, %c0_17, %c0_18] : memref<1x8x32xf32, #tpu.memory_space<vmem>>, vector<1x8x32xf32>
    %33 = vector.shape_cast %32 : vector<1x8x32xf32> to vector<8x32xf32>
    %34 = vector.shape_cast %31 : vector<8x32xf32> to vector<1x8x32xf32>
    tpu.vector_store %arg5[%c0_16, %c0_17, %c0_18], %34 {strides = array<i32>} : memref<1x8x32xf32, #tpu.memory_space<vmem>>, vector<1x8x32xf32>,
    return
  }
  func.func @transform_0(%arg0: i32) -> (i32, i32, i32) {
    %c0_i32 = arith.constant 0 : i32
    %c0_i32_0 = arith.constant 0 : i32
    %c0_i32_1 = arith.constant 0 : i32
    return %arg0, %c0_i32, %c0_i32_0 : i32, i32, i32
  }
  func.func @transform_1(%arg0: i32) -> (i32, i32, i32) {
    %c0_i32 = arith.constant 0 : i32
    %c0_i32_0 = arith.constant 0 : i32
    %c0_i32_1 = arith.constant 0 : i32
    %c0_i32_2 = arith.constant 0 : i32
    return %c0_i32, %c0_i32_0, %c0_i32_1 : i32, i32, i32
  }
  func.func @transform_2(%arg0: i32) -> (i32, i32, i32) {
    %c0_i32 = arith.constant 0 : i32
    %c0_i32_0 = arith.constant 0 : i32
    %c0_i32_1 = arith.constant 0 : i32
    %c0_i32_2 = arith.constant 0 : i32
    return %c0_i32, %c0_i32_0, %c0_i32_1 : i32, i32, i32
  }
  func.func @transform_3(%arg0: i32) -> (i32, i32) {
    %c0_i32 = arith.constant 0 : i32
    %c0_i32_0 = arith.constant 0 : i32
    %c0_i32_1 = arith.constant 0 : i32
    return %c0_i32, %c0_i32_0 : i32, i32
  }
  func.func @transform_4(%arg0: i32) -> (i32, i32, i32) {
    %c0_i32 = arith.constant 0 : i32
    %c0_i32_0 = arith.constant 0 : i32
    %c0_i32_1 = arith.constant 0 : i32
    return %arg0, %c0_i32, %c0_i32_0 : i32, i32, i32
  }
}

</mosaic_0001>

<bundles_post_ra>
// kernel: tpu_custom_call.1
= control target key start
LH: loop header
LB: loop body
LE: loop exit
PB: predicated region body
PF: predicated region fallthrough
CT: control target
= control target key end

     0   :  { %9 = vsyncpa [#allocation3], 0  ;;  %s2967_s0 = inlined_call_operand.vmem [shape: bf16[2,8,32], index: 0, kind: input, shape index: {}]   ;;  %s2968_s1 = inlined_call_operand.vmem [shape: bf16[8,32,12], index: 1, kind: input, shape index: {}]   ;;  %s2969_s2 = inlined_call_operand.vmem [shape: bf16[8,4,32], index: 2, kind: input, shape index: {}]   ;;  %s2970_s3 = inlined_call_operand.vmem [shape: f32[1,32], index: 3, kind: input, shape index: {}]   ;;  %s2971_s4 = inlined_call_operand.hbm [shape: f32[2,8,32], index: 4, kind: output, shape index: {}]  }
   0x1   :  { %11 = vsyncpa [#allocation3 + $0x1], 0  ;;  %s2536_s15 = smov 0   ;;  %s2538_s16 = smov 0  }
   0x2   :  { %s2540_s17 = smov 0   ;;  %s2542_s18 = smov 0  }
   0x3 LB: > { %s2557_s19 = sadd.s32 4294967295, %s2504_s18   ;;  %s2012_s20 = sadd.s32 4294967294, %s2504_s18   ;;  %s2504_s18 = sphi %s2542_s18, %s2977_s18   ;;  %s2500_s17 = sphi %s2540_s17, %s2976_s17   ;;  %s2496_s16 = sphi %s2538_s16, %s2975_s16   ;;  %s2492_s15 = sphi %s2536_s15, %s2974_s15  }
   0x4   : > { %s2561_s21 = sadd.s32 1, %s2504_s18   ;;  %s113_s22 = sadd.s32 1, %s2500_s17 }
   0x5   : > { %s110_s23 = ssub.s32 %s2504_s18, %s2561_s21  ;;  %p123_p0 = scmp.ne.s32.totalorder %s2500_s17, %s2496_s16 }
   0x6   : > { %p111_p1 = scmp.eq.s32.totalorder %s110_s23, 0  ;;  %p124_p2 = scmp.eq.s32.totalorder %s2557_s19, 1 }
   0x7   : > { %p129_p3 = scmp.ne.s32.totalorder %s2496_s16, %s2492_s15  ;;  %p130_p4 = scmp.eq.s32.totalorder %s2012_s20, 1 }
   0x8   : > { %s2572_s24 = scalar_select %p111_p1, %s2500_s17, %s113_s22  }
   0x9   : > { %p2574_p5 = por %p124_p2, %p123_p0  ;;  %p2578_p6 = por %p130_p4, %p129_p3 }
   0xa   : > { %p2015_p7 = scmp.ge.s32.totalorder %s2504_s18, 1  ;;  %p164_p8 = scmp.lt.s32.totalorder %s2504_s18, 3 }
   0xc   : > { %p165_p9 = pnand %p2015_p7, %p164_p8 }
   0xd   : > { %v2394_v0 = vld [vmem:[%s2968_s1] sm:$0xff] (!%p165_p9)   ;;  %v2506_v1 = vmov (!%p165_p9), 0.0   ;;  %v2395_v2 = vld [vmem:[%s2968_s1 + $0x10] sm:$0xff] (!%p165_p9)   ;;  %v2396_v3 = vld [vmem:[%s2968_s1 + $0x8] sm:$0xff] (!%p165_p9)   ;;  %vm2507_vm0 = vmmov (!%p165_p9), 0   ;;  %p189_p10 = scmp.lt.s32.totalorder (!%p165_p9), %s2557_s19, 1 }
   0xe   : > { %168 = sbr.rel (%p165_p9) target bundleno = 1409 (0x581), region = 36  ;;  %2143 = vmatprep.subr.bf16.mxu0 (!%p165_p9), %v2506_v1  ;;  %2151 = vmatprep.subr.bf16.mxu1 (!%p165_p9), %v2506_v1  ;;  %v2397_v4 = vld [vmem:[%s2968_s1 + $0x18] sm:$0xff] (!%p165_p9)   ;;  %vm239_vm1 = vcmask (!%p165_p9), 261120   ;;  %v2398_v5 = vld [vmem:[%s2968_s1 + $0x20] sm:$0xff] (!%p165_p9)   ;;  %v2399_v6 = vld [vmem:[%s2968_s1 + $0x30] sm:$0xff] (!%p165_p9)   ;;  %s2508_s30 = smov (!%p165_p9), 124  }
   0xf   : > { %2144 = vmatpush3.bf16.msra.mxu0 (!%p165_p9), %v2394_v0  ;;  %2147 = vmatprep.mubr.msk.bf16.mxu0 (!%p165_p9), %vm2507_vm0, %v2506_v1  ;;  %v2400_v8 = vld [vmem:[%s2968_s1 + $0x28] sm:$0xff] (!%p165_p9)   ;;  %v2401_v9 = vld [vmem:[%s2968_s1 + $0x38] sm:$0xff] (!%p165_p9)   ;;  %v2402_v10 = vld [vmem:[%s2968_s1 + $0x40] sm:$0xff] (!%p165_p9)   ;;  %s2509_s5 = smov (!%p165_p9), 120   ;;  %vm658_vm2 = vcmask (!%p165_p9), 31744   ;;  %vm1150_vm3 = vcmask (!%p165_p9), 1043456  }
  0x10   : > { %2152 = vmatpush3.bf16.msra.mxu1 (!%p165_p9), %v2395_v2  ;;  %2145 = vmatprep.subr.bf16.mxu0 (!%p165_p9), %v2506_v1  ;;  %v2403_v11 = vld [vmem:[%s2968_s1 + $0x50] sm:$0xff] (!%p165_p9)   ;;  %v2404_v12 = vld [vmem:[%s2968_s1 + $0x48] sm:$0xff] (!%p165_p9)   ;;  %v2405_v13 = vld [vmem:[%s2968_s1 + $0x58] sm:$0xff] (!%p165_p9)   ;;  %vm1048_vm4 = vcmask (!%p165_p9), 64512   ;;  %vm1549_vm5 = vcmask (!%p165_p9), 1041408   ;;  %s2510_s22 = smov (!%p165_p9), [#allocation2]  }
  0x11   : > { %2153 = vmatprep.subr.bf16.mxu1 (!%p165_p9), %v2506_v1  ;;  %2155 = vmatprep.mubr.msk.bf16.mxu1 (!%p165_p9), %vm2507_vm0, %v2506_v1  ;;  %v2406_v14 = vld [vmem:[%s2968_s1 + $0x60] sm:$0xff] (!%p165_p9)   ;;  %v2407_v15 = vld [vmem:[%s2968_s1 + $0x70] sm:$0xff] (!%p165_p9)   ;;  %v2408_v16 = vld [vmem:[%s2968_s1 + $0x68] sm:$0xff] (!%p165_p9)   ;;  %s2446_s23 = sshll.u32 (!%p165_p9), %s2510_s22, 4  ;;  %s2447_s23 = int_to_ptr.vmem [resolvable:$false] %s2446_s23 }
  0x12   : > { %v2409_v17 = vld [vmem:[%s2968_s1 + $0x78] sm:$0xff] (!%p165_p9)   ;;  %s2448_s27 = scalar_lea.vmem (!%p165_p9), %s2447_s23, 256 }
  0x13   : > { %2146 = vmatpush3.bf16.msra.mxu0 (!%p165_p9), %v2396_v3 }
  0x14   : > { %2154 = vmatpush3.bf16.msra.mxu1 (!%p165_p9), %v2397_v4  ;;  %2159 = vmatprep.subr.bf16.mxu0 (!%p165_p9), %v2506_v1 }
  0x15   : > { %s190_s9 = scalar_select %p189_p10, %s2557_s19, 1  ;;  %2167 = vmatprep.subr.bf16.mxu1 %v2506_v1 }
  0x17   : > { %s2017_s10 = sshll.u32 %s190_s9, 2  ;;  %s2068_s9 = sshll.u32 %s2557_s19, 7 }
  0x18   : > { %s192_s20 = scalar_lea.vmem %s2967_s0, %s2017_s10  ;;  %s2924_s14 = scalar_lea.hbm %s2971_s4, %s2068_s9 }
  0x19   : > { %v194_v7 = vld [vmem:[%s192_s20] sm:$0xf] }
  0x1a   : > { %2148 = vmatmul.mubr.msk.bf16.vlgmr.msra.gmra.mrb[0].mxu0 %vm239_vm1, %v194_v7  ;;  %2156 = vmatmul.mubr.msk.bf16.vlgmr.msra.gmra.mrb[0].mxu1 %vm239_vm1, %v194_v7 }
  0x1b   : > { %2160 = vmatpush3.bf16.msra.mxu0 %v2398_v5  ;;  %2168 = vmatpush3.bf16.msra.mxu1 %v2399_v6 }
  0x1c   : > { %2161 = vmatprep.subr.bf16.mxu0 %v2506_v1  ;;  %2169 = vmatprep.subr.bf16.mxu1 %v2506_v1 }
  0x1d   : > { %2163 = vmatprep.mubr.msk.bf16.mxu0 %vm2507_vm0, %v2506_v1  ;;  %2171 = vmatprep.mubr.msk.bf16.mxu1 %vm2507_vm0, %v2506_v1 }
  0x1f   : > { %2162 = vmatpush3.bf16.msra.mxu0 %v2400_v8  ;;  %2170 = vmatpush3.bf16.msra.mxu1 %v2401_v9 }
  0x20   : > { %2175 = vmatprep.subr.bf16.mxu0 %v2506_v1  ;;  %2183 = vmatprep.subr.bf16.mxu1 %v2506_v1 }
  0x22   : > { %2164 = vmatmul.mubr.msk.bf16.vlgmr.msra.gmra.mrb[4].mxu0 %vm239_vm1, %v194_v7  ;;  %2172 = vmatmul.mubr.msk.bf16.vlgmr.msra.gmra.mrb[4].mxu1 %vm239_vm1, %v194_v7 }
  0x23   : > { %2176 = vmatpush3.bf16.msra.mxu0 %v2402_v10  ;;  %2184 = vmatpush3.bf16.msra.mxu1 %v2403_v11 }
  0x24   : > { %2177 = vmatprep.subr.bf16.mxu0 %v2506_v1  ;;  %2185 = vmatprep.subr.bf16.mxu1 %v2506_v1 }
  0x25   : > { %2179 = vmatprep.mubr.msk.bf16.mxu0 %vm2507_vm0, %v2506_v1  ;;  %2187 = vmatprep.mubr.msk.bf16.mxu1 %vm2507_vm0, %v2506_v1 }
  0x27   : > { %2178 = vmatpush3.bf16.msra.mxu0 %v2404_v12  ;;  %2186 = vmatpush3.bf16.msra.mxu1 %v2405_v13 }
  0x28   : > { %2191 = vmatprep.subr.bf16.mxu0 %v2506_v1  ;;  %2199 = vmatprep.subr.bf16.mxu1 %v2506_v1 }
  0x2a   : > { %2180 = vmatmul.mubr.msk.bf16.vlgmr.msra.gmra.mrb[8].mxu0 %vm239_vm1, %v194_v7  ;;  %2188 = vmatmul.mubr.msk.bf16.vlgmr.msra.gmra.mrb[8].mxu1 %vm239_vm1, %v194_v7 }
  0x2b   : > { %2192 = vmatpush3.bf16.msra.mxu0 %v2406_v14  ;;  %2200 = vmatpush3.bf16.msra.mxu1 %v2407_v15 }
  0x2c   : > { %2193 = vmatprep.subr.bf16.mxu0 %v2506_v1  ;;  %2201 = vmatprep.subr.bf16.mxu1 %v2506_v1 }
  0x2d   : > { %2195 = vmatprep.mubr.msk.bf16.mxu0 %vm2507_vm0, %v2506_v1  ;;  %2203 = vmatprep.mubr.msk.bf16.mxu1 %vm2507_vm0, %v2506_v1 }
  0x2f   : > { %2194 = vmatpush3.bf16.msra.mxu0 %v2408_v16  ;;  %2202 = vmatpush3.bf16.msra.mxu1 %v2409_v17 }
  0x30   : > { %2207 = vmatprep.subr.bf16.mxu0 %v2506_v1  ;;  %2213 = vmatprep.subr.bf16.mxu1 %v2506_v1 }
  0x32   : > { %2196 = vmatmul.mubr.msk.bf16.vlgmr.msra.gmra.mrb[12].mxu0 %vm239_vm1, %v194_v7  ;;  %2204 = vmatmul.mubr.msk.bf16.vlgmr.msra.gmra.mrb[12].mxu1 %vm239_vm1, %v194_v7 }
  0x33   : > { %2209 = vmatprep.mubr.msk.bf16.mxu0 %vm2507_vm0, %v2506_v1  ;;  %2215 = vmatprep.mubr.msk.bf16.mxu1 %vm2507_vm0, %v2506_v1 }
  0xed   : > { %v277_v18 = vpop.f32.mrb[0].mxu0  ;;  %v329_v21 = vpop.f32.mrb[0].mxu1 }
  0xee   : > { %v647_v19 = vpack.c.bf16 %v277_v18, %v277_v18  ;;  %v2149_v20 = vpop.f32.mrb[1].mxu0  ;;  %v2157_v23 = vpop.f32.mrb[1].mxu1  ;;  %v2683_v24 = vpack.c.bf16 %v329_v21, %v329_v21 }
  0xef   : > { %v280_v22 = vpop.f32.mrb[2].mxu0  ;;  %v332_v25 = vpop.f32.mrb[2].mxu1 }
  0xf0   : > { %656 = vrot.lane.b32.xlu0 %v647_v19, %s2508_s30  ;;  %v2150_v26 = vpop.f32.mrb[3].mxu0  ;;  %v2158_v27 = vpop.f32.mrb[3].mxu1 }
  0xf4   : > { %706 = vrot.lane.b32.xlu0 %v2683_v24, %s2508_s30 }
  0xf5   : > { %v381_v28 = vpop.f32.mrb[4].mxu0  ;;  %v433_v31 = vpop.f32.mrb[4].mxu1 }
  0xf6   : > { %v2688_v29 = vpack.c.bf16 %v381_v28, %v381_v28  ;;  %v2165_v30 = vpop.f32.mrb[5].mxu0  ;;  %v2173_v33 = vpop.f32.mrb[5].mxu1  ;;  %v2690_v34 = vpack.c.bf16 %v433_v31, %v433_v31 }
  0xf7   : > { %v384_v32 = vpop.f32.mrb[6].mxu0  ;;  %v436_v35 = vpop.f32.mrb[6].mxu1 }
  0xf8   : > { %755 = vrot.lane.b32.xlu1 %v2688_v29, %s2508_s30  ;;  %v2166_v36 = vpop.f32.mrb[7].mxu0  ;;  %v2174_v37 = vpop.f32.mrb[7].mxu1 }
  0xfc   : > { %804 = vrot.lane.b32.xlu1 %v2690_v34, %s2508_s30 }
  0xfd   : > { %v485_v38 = vpop.f32.mrb[8].mxu0  ;;  %v537_v40 = vpop.f32.mrb[8].mxu1 }
  0xfe   : > { %v2696_v39 = vpack.c.bf16 %v485_v38, %v485_v38  ;;  %v2181_v41 = vpop.f32.mrb[9].mxu0  ;;  %v2698_v42 = vpack.c.bf16 %v537_v40, %v537_v40  ;;  %v2189_v43 = vpop.f32.mrb[9].mxu1 }
  0xff   : > { %v488_v44 = vpop.f32.mrb[10].mxu0  ;;  %v540_v45 = vpop.f32.mrb[10].mxu1 }
 0x100   : > { %853 = vrot.lane.b32.xlu0 %v2696_v39, %s2508_s30  ;;  %v2182_v46 = vpop.f32.mrb[11].mxu0  ;;  %v2190_v47 = vpop.f32.mrb[11].mxu1  ;;  %902 = vrot.lane.b32.xlu1 %v2698_v42, %s2508_s30 }
 0x105   : > { %v589_v48 = vpop.f32.mrb[12].mxu0  ;;  %v641_v50 = vpop.f32.mrb[12].mxu1 }
 0x106   : > { %v2704_v49 = vpack.c.bf16 %v589_v48, %v589_v48  ;;  %v2197_v51 = vpop.f32.mrb[13].mxu0  ;;  %v2706_v52 = vpack.c.bf16 %v641_v50, %v641_v50  ;;  %v2205_v54 = vpop.f32.mrb[13].mxu1 }
 0x107   : > { %v592_v53 = vpop.f32.mrb[14].mxu0  ;;  %v644_v56 = vpop.f32.mrb[14].mxu1 }
 0x108   : > { %951 = vrot.lane.b32.xlu0 %v2704_v49, %s2508_s30  ;;  %v2198_v55 = vpop.f32.mrb[15].mxu0  ;;  %1000 = vrot.lane.b32.xlu1 %v2706_v52, %s2508_s30  ;;  %v2206_v57 = vpop.f32.mrb[15].mxu1 }
 0x10c   : > { %1145 = vrot.lane.b32.xlu0 %v647_v19, %s2509_s5  ;;  %1194 = vrot.lane.b32.xlu1 %v2683_v24, %s2509_s5 }
 0x162   : > { %v657_v58 = vpop.permute.xlu0 %656 }
 0x163   : > { %v663_v59 = vsel %vm658_vm2, %v657_v58, 0 }
 0x164   : > { %2208 = vmatpush3.bf16.xpose.msra.mxu0 %v663_v59 }
 0x165   : > { %2219 = vmatprep.subr.bf16.mxu0 %v2506_v1 }
 0x166   : > { %v707_v60 = vpop.permute.xlu0 %706 }
 0x167   : > { %v712_v61 = vsel %vm658_vm2, %v707_v60, 0 }
 0x168   : > { %2214 = vmatpush3.bf16.xpose.msra.mxu1 %v712_v61 }
 0x169   : > { %2225 = vmatprep.subr.bf16.mxu1 %v2506_v1 }
 0x16a   : > { %v756_v62 = vpop.permute.xlu1 %755 }
 0x16b   : > { %v761_v63 = vsel %vm658_vm2, %v756_v62, 0  ;;  %2210 = vmatmul.mubr.msk.bf16.vlgmr.msra.gmra.mrb[16].mxu0 %vm658_vm2, %v647_v19 }
 0x16c   : > { %2220 = vmatpush3.bf16.xpose.msra.mxu0 %v761_v63  ;;  %2221 = vmatprep.mubr.msk.bf16.mxu0 %vm2507_vm0, %v2506_v1 }
 0x16d   : > { %2231 = vmatprep.subr.bf16.mxu0 %v2506_v1 }
 0x16e   : > { %v805_v0 = vpop.permute.xlu1 %804 }
 0x16f   : > { %v810_v2 = vsel %vm658_vm2, %v805_v0, 0  ;;  %2216 = vmatmul.mubr.msk.bf16.vlgmr.msra.gmra.mrb[16].mxu1 %vm658_vm2, %v2683_v24 }
 0x170   : > { %2226 = vmatpush3.bf16.xpose.msra.mxu1 %v810_v2  ;;  %2227 = vmatprep.mubr.msk.bf16.mxu1 %vm2507_vm0, %v2506_v1 }
 0x171   : > { %2237 = vmatprep.subr.bf16.mxu1 %v2506_v1 }
 0x172   : > { %v854_v3 = vpop.permute.xlu0 %853  ;;  %v903_v5 = vpop.permute.xlu1 %902 }
 0x173   : > { %v859_v4 = vsel %vm658_vm2, %v854_v3, 0  ;;  %2222 = vmatmul.mubr.msk.bf16.vlgmr.msra.gmra.mrb[20].mxu0 %vm658_vm2, %v2688_v29  ;;  %v908_v6 = vsel %vm658_vm2, %v903_v5, 0 }
 0x174   : > { %2232 = vmatpush3.bf16.xpose.msra.mxu0 %v859_v4  ;;  %2233 = vmatprep.mubr.msk.bf16.mxu0 %vm2507_vm0, %v2506_v1 }
 0x175   : > { %2243 = vmatprep.subr.bf16.mxu0 %v2506_v1 }
 0x177   : > { %2228 = vmatmul.mubr.msk.bf16.vlgmr.msra.gmra.mrb[20].mxu1 %vm658_vm2, %v2690_v34 }
 0x178   : > { %2238 = vmatpush3.bf16.xpose.msra.mxu1 %v908_v6  ;;  %2239 = vmatprep.mubr.msk.bf16.mxu1 %vm2507_vm0, %v2506_v1 }
 0x179   : > { %2249 = vmatprep.subr.bf16.mxu1 %v2506_v1 }
 0x17a   : > { %v952_v7 = vpop.permute.xlu0 %951  ;;  %v1001_v9 = vpop.permute.xlu1 %1000 }
 0x17b   : > { %v957_v8 = vsel %vm658_vm2, %v952_v7, 0  ;;  %2234 = vmatmul.mubr.msk.bf16.vlgmr.msra.gmra.mrb[24].mxu0 %vm658_vm2, %v2696_v39  ;;  %v1006_v10 = vsel %vm658_vm2, %v1001_v9, 0 }
 0x17c   : > { %2244 = vmatpush3.bf16.xpose.msra.mxu0 %v957_v8  ;;  %2245 = vmatprep.mubr.msk.bf16.mxu0 %vm2507_vm0, %v2506_v1 }
 0x17d   : > { %2255 = vmatprep.subr.bf16.mxu0 %v2506_v1 }
 0x17e   : > { %v1146_v11 = vpop.permute.xlu0 %1145  ;;  %v1195_v13 = vpop.permute.xlu1 %1194 }
 0x17f   : > { %2240 = vmatmul.mubr.msk.bf16.vlgmr.msra.gmra.mrb[24].mxu1 %vm658_vm2, %v2698_v42  ;;  %v1152_v12 = vsel %vm1150_vm3, %v1146_v11, 0  ;;  %v1200_v14 = vsel %vm1150_vm3, %v1195_v13, 0 }
 0x180   : > { %2250 = vmatpush3.bf16.xpose.msra.mxu1 %v1006_v10  ;;  %2251 = vmatprep.mubr.msk.bf16.mxu1 %vm2507_vm0, %v2506_v1 }
 0x181   : > { %2261 = vmatprep.subr.bf16.mxu1 %v2506_v1 }
 0x183   : > { %2246 = vmatmul.mubr.msk.bf16.vlgmr.msra.gmra.mrb[28].mxu0 %vm658_vm2, %v2704_v49 }
 0x184   : > { %2256 = vmatpush3.bf16.msra.mxu0 %v1152_v12  ;;  %2257 = vmatprep.mubr.msk.bf16.mxu0 %vm2507_vm0, %v2506_v1 }
 0x185   : > { %2267 = vmatprep.subr.bf16.mxu0 %v2506_v1 }
 0x187   : > { %2252 = vmatmul.mubr.msk.bf16.vlgmr.msra.gmra.mrb[28].mxu1 %vm658_vm2, %v2706_v52 }
 0x188   : > { %2262 = vmatpush3.bf16.msra.mxu1 %v1200_v14  ;;  %2263 = vmatprep.mubr.msk.bf16.mxu1 %vm2507_vm0, %v2506_v1 }
 0x189   : > { %2273 = vmatprep.subr.bf16.mxu1 %v2506_v1 }
 0x23e   : > { %v699_v15 = vpop.f32.mrb[16].mxu0 }
 0x23f   : > { %v2211_v16 = vpop.f32.mrb[17].mxu0  ;;  %v1049_v17 = vsel %vm1048_vm4, %v699_v15, -inf }
 0x240   : > { %1050 = vmax.xlane.f32.xlu0 %v1049_v17  ;;  %v702_v18 = vpop.f32.mrb[18].mxu0 }
 0x241   : > { %v2212_v19 = vpop.f32.mrb[19].mxu0 }
 0x242   : > { %v748_v20 = vpop.f32.mrb[16].mxu1 }
 0x243   : > { %v2217_v21 = vpop.f32.mrb[17].mxu1  ;;  %v1052_v22 = vsel %vm1048_vm4, %v748_v20, -inf }
 0x244   : > { %v751_v23 = vpop.f32.mrb[18].mxu1  ;;  %1053 = vmax.xlane.f32.xlu1 %v1052_v22 }
 0x245   : > { %v2218_v24 = vpop.f32.mrb[19].mxu1 }
 0x246   : > { %v797_v25 = vpop.f32.mrb[20].mxu0 }
 0x247   : > { %v2223_v26 = vpop.f32.mrb[21].mxu0  ;;  %v1055_v27 = vsel %vm1048_vm4, %v797_v25, -inf }
 0x248   : > { %1056 = vmax.xlane.f32.xlu0 %v1055_v27  ;;  %v800_v28 = vpop.f32.mrb[22].mxu0 }
 0x249   : > { %v2224_v30 = vpop.f32.mrb[23].mxu0 }
 0x24a   : > { %v846_v31 = vpop.f32.mrb[20].mxu1 }
 0x24b   : > { %v2229_v32 = vpop.f32.mrb[21].mxu1  ;;  %v1058_v33 = vsel %vm1048_vm4, %v846_v31, -inf }
 0x24c   : > { %v849_v35 = vpop.f32.mrb[22].mxu1  ;;  %1059 = vmax.xlane.f32.xlu0 %v1058_v33 }
 0x24d   : > { %v2230_v36 = vpop.f32.mrb[23].mxu1 }
 0x24e   : > { %v895_v37 = vpop.f32.mrb[24].mxu0 }
 0x24f   : > { %v2235_v38 = vpop.f32.mrb[25].mxu0  ;;  %v1061_v40 = vsel %vm1048_vm4, %v895_v37, -inf }
 0x250   : > { %1062 = vmax.xlane.f32.xlu1 %v1061_v40  ;;  %v898_v41 = vpop.f32.mrb[26].mxu0 }
 0x251   : > { %v2236_v43 = vpop.f32.mrb[27].mxu0 }
 0x252   : > { %v944_v44 = vpop.f32.mrb[24].mxu1 }
 0x253   : > { %v2241_v45 = vpop.f32.mrb[25].mxu1  ;;  %v1064_v46 = vsel %vm1048_vm4, %v944_v44, -inf }
 0x254   : > { %v947_v47 = vpop.f32.mrb[26].mxu1  ;;  %1065 = vmax.xlane.f32.xlu0 %v1064_v46 }
 0x255   : > { %v2242_v48 = vpop.f32.mrb[27].mxu1 }
 0x256   : > { %v993_v50 = vpop.f32.mrb[28].mxu0 }
 0x257   : > { %v2247_v51 = vpop.f32.mrb[29].mxu0  ;;  %v1067_v53 = vsel %vm1048_vm4, %v993_v50, -inf }
 0x258   : > { %1068 = vmax.xlane.f32.xlu1 %v1067_v53  ;;  %v996_v54 = vpop.f32.mrb[30].mxu0 }
 0x259   : > { %v2248_v55 = vpop.f32.mrb[31].mxu0 }
 0x25a   : > { %v1042_v56 = vpop.f32.mrb[28].mxu1 }
 0x25b   : > { %v2253_v57 = vpop.f32.mrb[29].mxu1  ;;  %v1070_v58 = vsel %vm1048_vm4, %v1042_v56, -inf }
 0x25c   : > { %v1045_v59 = vpop.f32.mrb[30].mxu1  ;;  %1071 = vmax.xlane.f32.xlu0 %v1070_v58 }
 0x25d   : > { %v2254_v60 = vpop.f32.mrb[31].mxu1 }
 0x269   : > { %1290 = vrot.lane.b32.xlu1 %v2690_v34, %s2509_s5 }
 0x272   : > { %1242 = vrot.lane.b32.xlu0 %v2688_v29, %s2509_s5 }
 0x2cd   : > { %v1051_v61 = vpop.xlane.xlu0 %1050 }
 0x2ce   : > { %v1073_v62 = vsub.f32 %v699_v15, %v1051_v61 }
 0x2d0   : > { %v1081_v63 = vmul.f32 1.442695, %v1073_v62 }
 0x2d1   : > { %v1054_v0 = vpop.xlane.xlu1 %1053 }
 0x2d2   : > { %2410 = vpow2.f32 %v1081_v63  ;;  %v1074_v2 = vsub.f32 %v748_v20, %v1054_v0 }
 0x2d4   : > { %v1083_v3 = vmul.f32 1.442695, %v1074_v2 }
 0x2d5   : > { %v1057_v4 = vpop.xlane.xlu0 %1056 }
 0x2d6   : > { %2412 = vpow2.f32 %v1083_v3  ;;  %v1075_v5 = vsub.f32 %v797_v25, %v1057_v4 }
 0x2d8   : > { %v1085_v6 = vmul.f32 1.442695, %v1075_v5 }
 0x2d9   : > { %v1060_v7 = vpop.xlane.xlu0 %1059 }
 0x2da   : > { %2414 = vpow2.f32 %v1085_v6  ;;  %v1076_v8 = vsub.f32 %v846_v31, %v1060_v7 }
 0x2dc   : > { %v2411_v9 = vpop.eup %2410  ;;  %v1087_v10 = vmul.f32 1.442695, %v1076_v8 }
 0x2dd   : > { %v1097_v34 = vsel %vm1048_vm4, %v2411_v9, 0.0  ;;  %v1063_v16 = vpop.xlane.xlu1 %1062 }
 0x2de   : > { %2416 = vpow2.f32 %v1087_v10  ;;  %1098 = vadd.xlane.f32.xlu1 %v1097_v34  ;;  %v1077_v17 = vsub.f32 %v895_v37, %v1063_v16 }
 0x2e0   : > { %v2413_v29 = vpop.eup %2412  ;;  %v1089_v21 = vmul.f32 1.442695, %v1077_v17  ;;  %v1538_v17 = vld [vmem:[%s2969_s2] sm:$0x3] }
 0x2e1   : > { %v1100_v11 = vsel %vm1048_vm4, %v2413_v29, 0.0  ;;  %v1066_v18 = vpop.xlane.xlu0 %1065 }
 0x2e2   : > { %1101 = vadd.xlane.f32.xlu0 %v1100_v11  ;;  %v1078_v20 = vsub.f32 %v944_v44, %v1066_v18  ;;  %2418 = vpow2.f32 %v1089_v21  ;;  %v1551_v18 = vsel %vm1549_vm5, %v1538_v17, 0  ;;  %v1540_v21 = vld [vmem:[%s2969_s2 + $0x4] sm:$0x3] }
 0x2e4   : > { %v2415_v12 = vpop.eup %2414  ;;  %v1091_v24 = vmul.f32 1.442695, %v1078_v20 }
 0x2e5   : > { %v1103_v13 = vsel %vm1048_vm4, %v2415_v12, 0.0  ;;  %v1069_v19 = vpop.xlane.xlu1 %1068 }
 0x2e6   : > { %1104 = vadd.xlane.f32.xlu1 %v1103_v13  ;;  %v1079_v22 = vsub.f32 %v993_v50, %v1069_v19  ;;  %2420 = vpow2.f32 %v1091_v24  ;;  %v1539_v19 = vld [vmem:[%s2969_s2 + $0x2] sm:$0x3] }
 0x2e7   : > { %v1597_v20 = vsel %vm1549_vm5, %v1539_v19, 0 }
 0x2e8   : > { %v2781_v14 = vpop.eup %2416  ;;  %v1093_v25 = vmul.f32 1.442695, %v1079_v22 }
 0x2e9   : > { %v1106_v15 = vsel %vm1048_vm4, %v2781_v14, 0.0  ;;  %v1072_v23 = vpop.xlane.xlu0 %1071  ;;  %v1291_v36 = vpop.permute.xlu1 %1290 }
 0x2ea   : > { %1107 = vadd.xlane.f32.xlu0 %v1106_v15  ;;  %v1080_v26 = vsub.f32 %v1042_v56, %v1072_v23  ;;  %2422 = vpow2.f32 %v1093_v25  ;;  %v1296_v51 = vsel %vm1150_vm3, %v1291_v36, 0  ;;  %v1643_v25 = vsel %vm1549_vm5, %v1540_v21, 0 }
 0x2ec   : > { %v1095_v27 = vmul.f32 1.442695, %v1080_v26 }
 0x2ed   : > { %v1243_v37 = vpop.permute.xlu0 %1242 }
 0x2ee   : > { %2424 = vpow2.f32 %v1095_v27  ;;  %v1248_v48 = vsel %vm1150_vm3, %v1243_v37, 0  ;;  %v1541_v27 = vld [vmem:[%s2969_s2 + $0x6] sm:$0x3] }
 0x2f7   : > { %1386 = vrot.lane.b32.xlu1 %v2698_v42, %s2509_s5  ;;  %v2789_v42 = vpop.eup %2418 }
 0x2f8   : > { %v2791_v28 = vpop.eup %2420 }
 0x2f9   : > { %v2795_v30 = vpop.eup %2422  ;;  %v1112_v31 = vsel %vm1048_vm4, %v2791_v28, 0.0 }
 0x2fa   : > { %v1115_v32 = vsel %vm1048_vm4, %v2795_v30, 0.0  ;;  %v2801_v33 = vpop.eup %2424 }
 0x2fb   : > { %v1118_v35 = vsel %vm1048_vm4, %v2801_v33, 0.0 }
 0x300   : > { %1338 = vrot.lane.b32.xlu0 %v2696_v39, %s2509_s5  ;;  %v1109_v39 = vsel %vm1048_vm4, %v2789_v42, 0.0 }
 0x31b   : > { %1110 = vadd.xlane.f32.xlu1 %v1109_v39 }
 0x31f   : > { %1113 = vadd.xlane.f32.xlu0 %v1112_v31  ;;  %1116 = vadd.xlane.f32.xlu1 %v1115_v32  ;;  %v1689_v31 = vsel %vm1549_vm5, %v1541_v27, 0 }
 0x323   : > { %1119 = vadd.xlane.f32.xlu1 %v1118_v35 }
 0x334   : > { %1482 = vrot.lane.b32.xlu1 %v2706_v52, %s2509_s5 }
 0x335   : > { %1434 = vrot.lane.b32.xlu0 %v2704_v49, %s2509_s5  ;;  %s186_s5 = sand.u32 1, %s2496_s16  }
 0x336   : > { %s2016_s6 = sshll.u32 %s186_s5, 3  ;;  %s1940_s20 = scalar_lea.sflag [#allocation3], %s186_s5 }
 0x337   : > { %s188_s10 = scalar_lea.vmem [#allocation2], %s2016_s6 }
 0x338   : > { %s1953_s11 = sshll.u32 %s188_s10, 4  ;;  %s2926_s11 = int_to_ptr.vmem [resolvable:$true] %s1953_s11 }
 0x339   : > { %s2442_s19 = scalar_lea.vmem %s2926_s11, 128  ;;  %p2449_p0 = scmp.lt.s32.totalorder %s2926_s11, %s2447_s23 }
 0x33a   : > { %p2443_p11 = scmp.ne.s32.totalorder %s2926_s11, %s2442_s19  ;;  %p2450_p1 = scmp.lt.s32.totalorder %s2448_s27, %s2442_s19 }
 0x33c   : > { %p2444_p12 = pnand %p2443_p11, %p2574_p5  ;;  %p2451_p2 = por %p2450_p1, %p2449_p0 }
 0x33e   : > { %p2445_p13 = pneg %p2444_p12 }
 0x340   : > { %p2452_p3 = pnand %p2451_p2, %p2445_p13 }
 0x36b   : > { %v1099_v38 = vpop.xlane.xlu1 %1098 }
 0x36c   : > { %2426 = vrcp.f32 %v1099_v38 }
 0x36f   : > { %v1102_v40 = vpop.xlane.xlu0 %1101 }
 0x370   : > { %2428 = vrcp.f32 %v1102_v40 }
 0x373   : > { %v1105_v41 = vpop.xlane.xlu1 %1104 }
 0x374   : > { %2430 = vrcp.f32 %v1105_v41 }
 0x376   : > { %v2427_v43 = vpop.eup %2426 }
 0x377   : > { %v1129_v44 = vmul.f32 %v2427_v43, %v2411_v9  ;;  %v1108_v45 = vpop.xlane.xlu0 %1107  ;;  %v1387_v59 = vpop.permute.xlu1 %1386  ;;  %v1543_v43 = vld [vmem:[%s2969_s2 + $0xa] sm:$0x3] }
 0x378   : > { %2432 = vrcp.f32 %v1108_v45  ;;  %v1392_v61 = vsel %vm1150_vm3, %v1387_v59, 0 }
 0x379   : > { %v1137_v46 = vpack.c.bf16 %v1129_v44, %v1129_v44 }
 0x37a   : > { %v2429_v47 = vpop.eup %2428 }
 0x37b   : > { %v1130_v52 = vmul.f32 %v2429_v47, %v2413_v29  ;;  %2258 = vmatmul.mubr.msk.bf16.vlgmr.msra.gmra.mrb[32].mxu0 %vm1048_vm4, %v1137_v46  ;;  %v1339_v54 = vpop.permute.xlu0 %1338 }
 0x37c   : > { %2268 = vmatpush3.bf16.msra.mxu0 %v1248_v48  ;;  %2269 = vmatprep.mubr.msk.bf16.mxu0 %vm2507_vm0, %v2506_v1  ;;  %v1344_v58 = vsel %vm1150_vm3, %v1339_v54, 0  ;;  %v1781_v48 = vsel %vm1549_vm5, %v1543_v43, 0 }
 0x37d   : > { %v1138_v49 = vpack.c.bf16 %v1130_v52, %v1130_v52  ;;  %2279 = vmatprep.subr.bf16.mxu0 %v2506_v1 }
 0x37e   : > { %v2431_v50 = vpop.eup %2430 }
 0x37f   : > { %v1131_v53 = vmul.f32 %v2431_v50, %v2415_v12  ;;  %2264 = vmatmul.mubr.msk.bf16.vlgmr.msra.gmra.mrb[32].mxu1 %vm1048_vm4, %v1138_v49  ;;  %v1544_v50 = vld [vmem:[%s2969_s2 + $0xc] sm:$0x3] }
 0x380   : > { %2274 = vmatpush3.bf16.msra.mxu1 %v1296_v51  ;;  %2275 = vmatprep.mubr.msk.bf16.mxu1 %vm2507_vm0, %v2506_v1 }
 0x381   : > { %v1139_v55 = vpack.c.bf16 %v1131_v53, %v1131_v53  ;;  %2285 = vmatprep.subr.bf16.mxu1 %v2506_v1 }
 0x382   : > { %v2433_v56 = vpop.eup %2432 }
 0x383   : > { %v1132_v57 = vmul.f32 %v2433_v56, %v2781_v14  ;;  %2270 = vmatmul.mubr.msk.bf16.vlgmr.msra.gmra.mrb[36].mxu0 %vm1048_vm4, %v1139_v55  ;;  %v1827_v55 = vsel %vm1549_vm5, %v1544_v50, 0 }
 0x384   : > { %2280 = vmatpush3.bf16.msra.mxu0 %v1344_v58  ;;  %2281 = vmatprep.mubr.msk.bf16.mxu0 %vm2507_vm0, %v2506_v1 }
 0x385   : > { %v1140_v60 = vpack.c.bf16 %v1132_v57, %v1132_v57  ;;  %2291 = vmatprep.subr.bf16.mxu0 %v2506_v1  ;;  %v1545_v57 = vld [vmem:[%s2969_s2 + $0xe] sm:$0x3] }
 0x387   : > { %2276 = vmatmul.mubr.msk.bf16.vlgmr.msra.gmra.mrb[36].mxu1 %vm1048_vm4, %v1140_v60 }
 0x388   : > { %2286 = vmatpush3.bf16.msra.mxu1 %v1392_v61  ;;  %2287 = vmatprep.mubr.msk.bf16.mxu1 %vm2507_vm0, %v2506_v1 }
 0x389   : > { %2297 = vmatprep.subr.bf16.mxu1 %v2506_v1 }
 0x3a8   : > { %v1111_v62 = vpop.xlane.xlu1 %1110 }
 0x3a9   : > { %2434 = vrcp.f32 %v1111_v62  ;;  %v1873_v62 = vsel %vm1549_vm5, %v1545_v57, 0 }
 0x3ac   : > { %v1114_v63 = vpop.xlane.xlu0 %1113  ;;  %v1117_v0 = vpop.xlane.xlu1 %1116 }
 0x3ad   : > { %2436 = vrcp.f32 %v1114_v63 }
 0x3ae   : > { %2438 = vrcp.f32 %v1117_v0 }
 0x3b0   : > { %v1120_v2 = vpop.xlane.xlu1 %1119  ;;  %v1435_v5 = vpop.permute.xlu0 %1434 }
 0x3b1   : > { %2440 = vrcp.f32 %v1120_v2  ;;  %v1440_v10 = vsel %vm1150_vm3, %v1435_v5, 0 }
 0x3b3   : > { %v2435_v3 = vpop.eup %2434 }
 0x3b4   : > { %v1133_v4 = vmul.f32 %v2435_v3, %v2789_v42  ;;  %v1483_v34 = vpop.permute.xlu1 %1482 }
 0x3b5   : > { %v1488_v13 = vsel %vm1150_vm3, %v1483_v34, 0 }
 0x3b6   : > { %v1141_v6 = vpack.c.bf16 %v1133_v4, %v1133_v4 }
 0x3b7   : > { %v2437_v7 = vpop.eup %2436 }
 0x3b8   : > { %v2439_v8 = vpop.eup %2438  ;;  %v1134_v9 = vmul.f32 %v2437_v7, %v2791_v28  ;;  %2282 = vmatmul.mubr.msk.bf16.vlgmr.msra.gmra.mrb[40].mxu0 %vm1048_vm4, %v1141_v6 }
 0x3b9   : > { %2292 = vmatpush3.bf16.msra.mxu0 %v1440_v10  ;;  %2293 = vmatprep.mubr.msk.bf16.mxu0 %vm2507_vm0, %v2506_v1  ;;  %v1135_v29 = vmul.f32 %v2439_v8, %v2795_v30 }
 0x3ba   : > { %v1142_v11 = vpack.c.bf16 %v1134_v9, %v1134_v9  ;;  %2303 = vmatprep.subr.bf16.mxu0 %v2506_v1 }
 0x3bb   : > { %v2441_v12 = vpop.eup %2440  ;;  %v1143_v15 = vpack.c.bf16 %v1135_v29, %v1135_v29 }
 0x3bc   : > { %2288 = vmatmul.mubr.msk.bf16.vlgmr.msra.gmra.mrb[40].mxu1 %vm1048_vm4, %v1142_v11  ;;  %v1136_v14 = vmul.f32 %v2441_v12, %v2801_v33  ;;  %v1542_v33 = vld [vmem:[%s2969_s2 + $0x8] sm:$0x3] }
 0x3bd   : > { %2298 = vmatpush3.bf16.msra.mxu1 %v1488_v13  ;;  %2299 = vmatprep.mubr.msk.bf16.mxu1 %vm2507_vm0, %v2506_v1  ;;  %v1735_v40 = vsel %vm1549_vm5, %v1542_v33, 0 }
 0x3be   : > { %2309 = vmatprep.subr.bf16.mxu1 %v2506_v1  ;;  %v1144_v16 = vpack.c.bf16 %v1136_v14, %v1136_v14 }
 0x3c0   : > { %2294 = vmatmul.mubr.msk.bf16.vlgmr.msra.gmra.mrb[44].mxu0 %vm1048_vm4, %v1143_v15 }
 0x3c1   : > { %2305 = vmatprep.mubr.msk.bf16.mxu0 %vm2507_vm0, %v2506_v1  ;;  %2304 = vmatpush3.bf16.msra.mxu0 %v1551_v18 }
 0x3c2   : > { %2315 = vmatprep.subr.bf16.mxu0 %v2506_v1 }
 0x3c4   : > { %2300 = vmatmul.mubr.msk.bf16.vlgmr.msra.gmra.mrb[44].mxu1 %vm1048_vm4, %v1144_v16 }
 0x3c5   : > { %2311 = vmatprep.mubr.msk.bf16.mxu1 %vm2507_vm0, %v2506_v1  ;;  %2310 = vmatpush3.bf16.msra.mxu1 %v1597_v20 }
 0x3c6   : > { %2321 = vmatprep.subr.bf16.mxu1 %v2506_v1 }
 0x44e   : > { %v1188_v22 = vpop.f32.mrb[32].mxu0 }
 0x44f   : > { %v1530_v23 = vpack.c.bf16 %v1188_v22, %v1188_v22  ;;  %v2259_v24 = vpop.f32.mrb[33].mxu0 }
 0x450   : > { %v1191_v26 = vpop.f32.mrb[34].mxu0 }
 0x451   : > { %v2260_v42 = vpop.f32.mrb[35].mxu0  ;;  %2306 = vmatmul.mubr.msk.bf16.vlgmr.msra.gmra.mrb[48].mxu0 %vm658_vm2, %v1530_v23 }
 0x452   : > { %v1236_v28 = vpop.f32.mrb[32].mxu1  ;;  %2316 = vmatpush3.bf16.msra.mxu0 %v1643_v25  ;;  %2317 = vmatprep.mubr.msk.bf16.mxu0 %vm2507_vm0, %v2506_v1 }
 0x453   : > { %v1531_v39 = vpack.c.bf16 %v1236_v28, %v1236_v28  ;;  %v2265_v30 = vpop.f32.mrb[33].mxu1  ;;  %2327 = vmatprep.subr.bf16.mxu0 %v2506_v1 }
 0x454   : > { %v1239_v32 = vpop.f32.mrb[34].mxu1 }
 0x455   : > { %v2266_v35 = vpop.f32.mrb[35].mxu1  ;;  %2312 = vmatmul.mubr.msk.bf16.vlgmr.msra.gmra.mrb[48].mxu1 %vm658_vm2, %v1531_v39 }
 0x456   : > { %v1284_v36 = vpop.f32.mrb[36].mxu0  ;;  %2322 = vmatpush3.bf16.msra.mxu1 %v1689_v31  ;;  %2323 = vmatprep.mubr.msk.bf16.mxu1 %vm2507_vm0, %v2506_v1 }
 0x457   : > { %v1532_v37 = vpack.c.bf16 %v1284_v36, %v1284_v36  ;;  %v2271_v38 = vpop.f32.mrb[37].mxu0  ;;  %2333 = vmatprep.subr.bf16.mxu1 %v2506_v1 }
 0x458   : > { %v1287_v41 = vpop.f32.mrb[38].mxu0 }
 0x459   : > { %v2272_v44 = vpop.f32.mrb[39].mxu0  ;;  %2318 = vmatmul.mubr.msk.bf16.vlgmr.msra.gmra.mrb[52].mxu0 %vm658_vm2, %v1532_v37 }
 0x45a   : > { %v1332_v45 = vpop.f32.mrb[36].mxu1  ;;  %2328 = vmatpush3.bf16.msra.mxu0 %v1735_v40  ;;  %2329 = vmatprep.mubr.msk.bf16.mxu0 %vm2507_vm0, %v2506_v1 }
 0x45b   : > { %v1533_v46 = vpack.c.bf16 %v1332_v45, %v1332_v45  ;;  %v2277_v47 = vpop.f32.mrb[37].mxu1  ;;  %2339 = vmatprep.subr.bf16.mxu0 %v2506_v1 }
 0x45c   : > { %v1335_v52 = vpop.f32.mrb[38].mxu1 }
 0x45d   : > { %v2278_v49 = vpop.f32.mrb[39].mxu1  ;;  %2324 = vmatmul.mubr.msk.bf16.vlgmr.msra.gmra.mrb[52].mxu1 %vm658_vm2, %v1533_v46 }
 0x45e   : > { %2334 = vmatpush3.bf16.msra.mxu1 %v1781_v48  ;;  %2335 = vmatprep.mubr.msk.bf16.mxu1 %vm2507_vm0, %v2506_v1 }
 0x45f   : > { %2345 = vmatprep.subr.bf16.mxu1 %v2506_v1 }
 0x48b   : > { %v1380_v51 = vpop.f32.mrb[40].mxu0 }
 0x48c   : > { %v1534_v53 = vpack.c.bf16 %v1380_v51, %v1380_v51  ;;  %v2283_v54 = vpop.f32.mrb[41].mxu0 }
 0x48d   : > { %v1383_v56 = vpop.f32.mrb[42].mxu0  ;;  %v2066_v54 = vld [vmem:[%s2970_s3] ss:$0 sm:$0xff] }
 0x48e   : > { %v2284_v58 = vpop.f32.mrb[43].mxu0  ;;  %2330 = vmatmul.mubr.msk.bf16.vlgmr.msra.gmra.mrb[56].mxu0 %vm658_vm2, %v1534_v53 }
 0x48f   : > { %v1428_v59 = vpop.f32.mrb[40].mxu1  ;;  %2340 = vmatpush3.bf16.msra.mxu0 %v1827_v55  ;;  %2341 = vmatprep.mubr.msk.bf16.mxu0 %vm2507_vm0, %v2506_v1 }
 0x490   : > { %v1535_v60 = vpack.c.bf16 %v1428_v59, %v1428_v59  ;;  %v2289_v61 = vpop.f32.mrb[41].mxu1 }
 0x491   : > { %v1431_v63 = vpop.f32.mrb[42].mxu1 }
 0x492   : > { %v2290_v0 = vpop.f32.mrb[43].mxu1  ;;  %2336 = vmatmul.mubr.msk.bf16.vlgmr.msra.gmra.mrb[56].mxu1 %vm658_vm2, %v1535_v60 }
 0x493   : > { %v1476_v2 = vpop.f32.mrb[44].mxu0  ;;  %2346 = vmatpush3.bf16.msra.mxu1 %v1873_v62  ;;  %2347 = vmatprep.mubr.msk.bf16.mxu1 %vm2507_vm0, %v2506_v1 }
 0x494   : > { %v1536_v3 = vpack.c.bf16 %v1476_v2, %v1476_v2  ;;  %v2295_v4 = vpop.f32.mrb[45].mxu0 }
 0x495   : > { %v1479_v5 = vpop.f32.mrb[46].mxu0 }
 0x496   : > { %v2296_v6 = vpop.f32.mrb[47].mxu0  ;;  %2342 = vmatmul.mubr.msk.bf16.vlgmr.msra.gmra.mrb[60].mxu0 %vm658_vm2, %v1536_v3 }
 0x497   : > { %v1524_v7 = vpop.f32.mrb[44].mxu1 }
 0x498   : > { %v1537_v8 = vpack.c.bf16 %v1524_v7, %v1524_v7  ;;  %v2301_v9 = vpop.f32.mrb[45].mxu1 }
 0x499   : > { %v1527_v10 = vpop.f32.mrb[46].mxu1 }
 0x49a   : > { %v2302_v34 = vpop.f32.mrb[47].mxu1  ;;  %2348 = vmatmul.mubr.msk.bf16.vlgmr.msra.gmra.mrb[60].mxu1 %vm658_vm2, %v1537_v8 }
 0x524   : > { %v1587_v29 = vpop.f32.mrb[48].mxu0 }
 0x525   : > { %v2307_v11 = vpop.f32.mrb[49].mxu0  ;;  %v1915_v1 = vsel %vm239_vm1, %v1587_v29, 0.0 }
 0x526   : > { %v1590_v12 = vpop.f32.mrb[50].mxu0 }
 0x527   : > { %v2308_v13 = vpop.f32.mrb[51].mxu0 }
 0x528   : > { %v1633_v14 = vpop.f32.mrb[48].mxu1 }
 0x529   : > { %v1916_v15 = vsel %vm239_vm1, %v1633_v14, 0.0  ;;  %v2313_v16 = vpop.f32.mrb[49].mxu1 }
 0x52a   : > { %v1917_v17 = vadd.f32 %v1916_v15, %v1915_v1  ;;  %v1636_v18 = vpop.f32.mrb[50].mxu1 }
 0x52b   : > { %v2314_v19 = vpop.f32.mrb[51].mxu1 }
 0x52c   : > { %v1679_v20 = vpop.f32.mrb[52].mxu0 }
 0x52d   : > { %v1918_v21 = vsel %vm239_vm1, %v1679_v20, 0.0  ;;  %v2319_v22 = vpop.f32.mrb[53].mxu0 }
 0x52e   : > { %v1919_v23 = vadd.f32 %v1918_v21, %v1917_v17  ;;  %v1682_v24 = vpop.f32.mrb[54].mxu0 }
 0x52f   : > { %v2320_v25 = vpop.f32.mrb[55].mxu0 }
 0x530   : > { %v1725_v26 = vpop.f32.mrb[52].mxu1 }
 0x531   : > { %v1920_v27 = vsel %vm239_vm1, %v1725_v26, 0.0  ;;  %v2325_v42 = vpop.f32.mrb[53].mxu1 }
 0x532   : > { %v1921_v28 = vadd.f32 %v1920_v27, %v1919_v23  ;;  %v1728_v39 = vpop.f32.mrb[54].mxu1 }
 0x533   : > { %v2326_v30 = vpop.f32.mrb[55].mxu1 }
 0x561   : > { %v1771_v31 = vpop.f32.mrb[56].mxu0 }
 0x562   : > { %v1922_v32 = vsel %vm239_vm1, %v1771_v31, 0.0  ;;  %v2331_v33 = vpop.f32.mrb[57].mxu0 }
 0x563   : > { %v1923_v35 = vadd.f32 %v1922_v32, %v1921_v28  ;;  %v1774_v36 = vpop.f32.mrb[58].mxu0 }
 0x564   : > { %v2332_v37 = vpop.f32.mrb[59].mxu0 }
 0x565   : > { %v1817_v38 = vpop.f32.mrb[56].mxu1 }
 0x566   : > { %v1924_v40 = vsel %vm239_vm1, %v1817_v38, 0.0  ;;  %v2337_v41 = vpop.f32.mrb[57].mxu1 }
 0x567   : > { %v1925_v43 = vadd.f32 %v1924_v40, %v1923_v35  ;;  %v1820_v44 = vpop.f32.mrb[58].mxu1 }
 0x568   : > { %v2338_v45 = vpop.f32.mrb[59].mxu1 }
 0x569   : > { %v1863_v46 = vpop.f32.mrb[60].mxu0 }
 0x56a   : > { %v1926_v47 = vsel %vm239_vm1, %v1863_v46, 0.0  ;;  %v2343_v48 = vpop.f32.mrb[61].mxu0 }
 0x56b   : > { %v1927_v52 = vadd.f32 %v1926_v47, %v1925_v43  ;;  %v1866_v49 = vpop.f32.mrb[62].mxu0 }
 0x56c   : > { %v2344_v50 = vpop.f32.mrb[63].mxu0 }
 0x56d   : > { %v1909_v51 = vpop.f32.mrb[60].mxu1 }
 0x56e   : > { %v1928_v53 = vsel %vm239_vm1, %v1909_v51, 0.0  ;;  %v2349_v55 = vpop.f32.mrb[61].mxu1 }
 0x56f   : > { %v1929_v56 = vadd.f32 %v1928_v53, %v1927_v52  ;;  %v1912_v57 = vpop.f32.mrb[62].mxu1 }
 0x570   : > { %v2350_v58 = vpop.f32.mrb[63].mxu1 }
 0x571   : > { %v1937_v59 = vadd.f32 %v2066_v54, %v1929_v56 }
 0x573   : > { %1938 = vst.msk [vmem:[%s188_s10] sm:$0xff] %vm239_vm1, %v1937_v59 }
 0x574   : > { %2455 = shalt.err (!%p2452_p3)
}
 0x575   : > { %s2456_s28 = scalar_lea.hbm %s2924_s14, 128  ;;  %s2460_s5 = scalar_lea.hbm %s2971_s4, 256 }
 0x576   : > { %p2457_p4 = scmp.ne.s32.totalorder %s2924_s14, %s2456_s28  ;;  %p2461_p9 = scmp.lt.u32.totalorder %s2924_s14, %s2971_s4 }
 0x577   : > { %p2462_p10 = scmp.lt.u32.totalorder %s2460_s5, %s2456_s28  ;;  %p2464_p12 = scmp.lt.u32.totalorder %s2456_s28, %s2924_s14 }
 0x578   : > { %p2458_p7 = pnand %p2457_p4, %p2574_p5 }
 0x579   : > { %p2463_p11 = por %p2462_p10, %p2461_p9 }
 0x57a   : > { %p2459_p8 = pneg %p2458_p7 }
 0x57b   : > { %p2465_p13 = por %p2464_p12, %p2463_p11 }
 0x57d   : > { %p2466_p0 = pnand %p2465_p13, %p2459_p8 }
 0x57f   : > { %2469 = shalt.err (!%p2466_p0)
}
 0x580   : > { %2351 = dma.vmem_to_hbm [thread:$0]  (%p2574_p5), %s2926_s11, 128, %s2924_s14, %s1940_s20  }
 0x581 PF: > { %p2357_p1 = scmp.ge.s32.totalorder %s2504_s18, 2  ;;  %s1965_s8 = sand.u32 1, %s2492_s15  }
 0x582   : > { %s1966_s9 = scalar_lea.sflag [#allocation3], %s1965_s8 }
 0x583   : > { %p2354_p2 = pnand %p2357_p1, %p2578_p6 }
 0x585   : > { %2487 = dma.done.wait (!%p2354_p2), %s1966_s9, 128  }
 0x586   : > { %2489 = vsyncadd (!%p2354_p2), %s1966_s9, 4294967168  ;;  %p14_p3 = scmp.ge.s32.totalorder %s2561_s21, 4   ;;  %s2974_s15 = smov %s2496_s16 }
 0x587   : > { %s2975_s16 = smov %s2500_s17  ;;  %s2976_s17 = smov %s2572_s24 }
 0x588   : > { %s2977_s18 = smov %s2561_s21  ;;  %16 = sbr.rel (!%p14_p3) target bundleno = 3 (0x3), region = 71 }
 0x58f   :  { %1971 = vsyncpa [#allocation3], 1 }
 0x590   :  { %1973 = vsyncpa [#allocation3 + $0x1], 1 }

</bundles_post_ra>
